<compile_context>
chip_gen: v7x
topology: tpu7x:2x2x1
jax: 0.10.0
libtpu: 0.0.40
codegen_flags: <defaults>
</compile_context>

<pallas_src>
import functools
import math

import jax
import jax.numpy as jnp
from jax.experimental import pallas as pl
from jax.experimental.pallas import tpu as pltpu


def _round_up(x: int, m: int) -> int:
    return ((x + m - 1) // m) * m


def _make_mlp_kernel(num_layers: int):
    """Kernel computing num_layers of (matmul + bias + ReLU), fully fused."""

    def kernel(*refs):
        # refs = (x_ref, w0, b0, w1, b1, ..., o_ref); one (TILE_N, C) row tile.
        x_ref = refs[0]
        o_ref = refs[-1]
        h = x_ref[...].astype(jnp.float32)
        for i in range(num_layers):
            w = refs[1 + 2 * i][...]                       # (C_in_i, C_out_i)
            b = refs[2 + 2 * i][...].astype(jnp.float32)   # (1, C_out_i)
            # Cast activations to the weight storage dtype for the MXU (no-op
            # for f32 weights, enables native bf16 feeds), accumulate in f32.
            h = jnp.dot(h.astype(w.dtype), w, preferred_element_type=jnp.float32)
            h = jnp.maximum(h + b, 0.0)                    # bias + ReLU per layer
        o_ref[...] = h.astype(o_ref.dtype)

    return kernel


def conv1d_multilayer_tokens(x_tok, weights, biases, *, tile_n: int = 512):
    """Fused pointwise-conv / ReLU stack on a token-major slab.

    x_tok:      (N, C_in)                activations (f32 or bf16)
    weights[i]: (C_in_i, C_out_i)        stored transposed for right-multiply
    biases[i]:  (C_out_i,)
    Returns (N, C_out_last).
    """
    N, C_in = x_tok.shape
    num_layers = len(weights)
    C_out = weights[-1].shape[1]
    dtype = x_tok.dtype

    weights = list(weights)
    biases = list(biases)

    # --- Lane-dense output: pad the final layer's C_out to a multiple of 128
    # so output stores are unmasked full-width vst.  Padded lanes compute
    # relu(0) = 0 and are sliced off below.
    C_out_pad = _round_up(C_out, 128)
    if C_out_pad != C_out:
        weights[-1] = jnp.pad(weights[-1], ((0, 0), (0, C_out_pad - C_out)))
        biases[-1] = jnp.pad(biases[-1], ((0, C_out_pad - C_out),))
    # NOTE: intermediate channel widths are left as-is; for production configs
    # with >=64 channels, pad hidden widths to multiples of 128 as well.

    # --- Row tiling: multiples of 8 (sublane), capped at tile_n; pad N so the
    # grid has no partial tiles (padded rows compute relu(bias) and are sliced
    # off by the caller).
    tile_n = max(8, min(tile_n, _round_up(N, 8)))
    N_pad = _round_up(N, tile_n)
    if N_pad != N:
        x_tok = jnp.pad(x_tok, ((0, N_pad - N), (0, 0)))
    num_tiles = N_pad // tile_n

    kernel = _make_mlp_kernel(num_layers)

    # Input/output tiles march along the row axis; weights/biases are pinned
    # (constant block index) so Pallas keeps them resident in VMEM.
    in_specs = [pl.BlockSpec((tile_n, C_in), lambda i: (i, 0))]
    operands = [x_tok]
    flops = 0
    bytes_accessed = x_tok.size * x_tok.dtype.itemsize
    for w, b in zip(weights, biases):
        ci, co = w.shape
        w = w.astype(dtype)
        b2 = b.reshape(1, co).astype(jnp.float32)
        in_specs.append(pl.BlockSpec((ci, co), lambda i: (0, 0)))
        in_specs.append(pl.BlockSpec((1, co), lambda i: (0, 0)))
        operands.append(w)
        operands.append(b2)
        flops += 2 * N_pad * ci * co
        bytes_accessed += w.size * w.dtype.itemsize + b2.size * b2.dtype.itemsize
    bytes_accessed += N_pad * C_out_pad * jnp.dtype(dtype).itemsize

    out_tok = pl.pallas_call(
        kernel,
        out_shape=jax.ShapeDtypeStruct((N_pad, C_out_pad), dtype),
        grid=(num_tiles,),
        in_specs=in_specs,
        out_specs=pl.BlockSpec((tile_n, C_out_pad), lambda i: (i, 0)),
        compiler_params=pltpu.CompilerParams(
            dimension_semantics=("parallel",),      # megacore-shard row tiles (v7x)
            vmem_limit_bytes=32 * 1024 * 1024,      # safe on v5e/v6e/v7x
        ),
        cost_estimate=pl.CostEstimate(
            flops=flops, transcendentals=0, bytes_accessed=bytes_accessed
        ),
    )(*operands)

    return out_tok[:N, :C_out]


def conv1d_multilayer_pallas(x_ncl, weights, biases, *, tile_n: int = 512):
    """PyTorch-layout wrapper: x_ncl is (B, C_in, L), returns (B, C_out, L).

    Prefer conv1d_multilayer_tokens if the surrounding model already holds
    token-major activations — it avoids two full HBM transposes.
    """
    B, C_in, L = x_ncl.shape
    C_out = weights[-1].shape[1]
    # NCL -> (B*L, C) token-major slab (channels on lanes).
    x_tok = jnp.transpose(x_ncl, (0, 2, 1)).reshape(B * L, C_in)
    out_tok = conv1d_multilayer_tokens(x_tok, weights, biases, tile_n=tile_n)
    # (N, C_out) -> (B, L, C_out) -> NCL (slice + transpose fuse in XLA).
    return jnp.transpose(out_tok.reshape(B, L, C_out), (0, 2, 1))


def _xavier_uniform(key, fan_in, fan_out):
    # Matches nn.init.xavier_uniform_ on a Conv1d weight of shape (out, in, 1):
    # bound = sqrt(6 / (fan_in + fan_out)); stored (C_in, C_out) for h @ W.
    bound = math.sqrt(6.0 / (fan_in + fan_out))
    return jax.random.uniform(key, (fan_in, fan_out), jnp.float32, -bound, bound)


def _reference(x_ncl, weights, biases):
    """Pure-JAX reference of the PyTorch forward (pointwise conv + ReLU stack)."""
    h = jnp.transpose(x_ncl, (0, 2, 1))  # (B, L, C)
    for w, b in zip(weights, biases):
        h = jnp.maximum(jnp.einsum("blc,cd->bld", h, w) + b, 0.0)
    return jnp.transpose(h, (0, 2, 1))


# TODO(synk): dropout (dropout_keep < 1.0) and batch_norm=True variants are not
# implemented; the module's defaults make both identity in this forward pass.


if __name__ == "__main__":
    # layer_sizes as in Conv1dMultiLayer([...]); dropout_keep=1.0, batch_norm=False.
    layer_sizes = [4, 32, 32, 8]
    B, L = 2, 16

    key = jax.random.PRNGKey(0)
    key, xkey = jax.random.split(key)
    x = jax.random.normal(xkey, (B, layer_sizes[0], L), jnp.float32)  # NCL input

    weights, biases = [], []
    for cin, cout in zip(layer_sizes[:-1], layer_sizes[1:]):
        key, wkey = jax.random.split(key)
        weights.append(_xavier_uniform(wkey, cin, cout))
        biases.append(jnp.zeros((cout,), jnp.float32))  # conv.bias.data.fill_(0.0)

    run = jax.jit(functools.partial(conv1d_multilayer_pallas, tile_n=512))
    out = jax.block_until_ready(run(x, weights, biases))

    ref = _reference(x, weights, biases)
    assert out.shape == (B, layer_sizes[-1], L), out.shape
    assert jnp.allclose(out, ref, atol=1e-5, rtol=1e-5), float(jnp.max(jnp.abs(out - ref)))

    print("KERNEL_OK")
</pallas_src>

<mosaic_0001>
module attributes {stable_mosaic.version = 11 : i64} {
  func.func @kernel(%arg0: i32, %arg1: memref<32x4xf32, #tpu.memory_space<vmem>>, %arg2: memref<4x32xf32, #tpu.memory_space<vmem>>, %arg3: memref<1x32xf32, #tpu.memory_space<vmem>>, %arg4: memref<32x32xf32, #tpu.memory_space<vmem>>, %arg5: memref<1x32xf32, #tpu.memory_space<vmem>>, %arg6: memref<32x128xf32, #tpu.memory_space<vmem>>, %arg7: memref<1x128xf32, #tpu.memory_space<vmem>>, %arg8: memref<32x128xf32, #tpu.memory_space<vmem>>) attributes {dimension_semantics = [#tpu.dimension_semantics<parallel>], iteration_bounds = array<i64: 1>, scalar_prefetch = 0 : i64, scratch_operands = 0 : i64, tpu.core_type = #tpu.core_type<tc>, window_params = [{transform_indices = @transform_0, window_bounds = array<i64: 32, 4>}, {pipeline_mode = #tpu.pipeline_mode<synchronous>, transform_indices = @transform_1, window_bounds = array<i64: 4, 32>}, {pipeline_mode = #tpu.pipeline_mode<synchronous>, transform_indices = @transform_2, window_bounds = array<i64: 1, 32>}, {pipeline_mode = #tpu.pipeline_mode<synchronous>, transform_indices = @transform_3, window_bounds = array<i64: 32, 32>}, {pipeline_mode = #tpu.pipeline_mode<synchronous>, transform_indices = @transform_4, window_bounds = array<i64: 1, 32>}, {pipeline_mode = #tpu.pipeline_mode<synchronous>, transform_indices = @transform_5, window_bounds = array<i64: 32, 128>}, {pipeline_mode = #tpu.pipeline_mode<synchronous>, transform_indices = @transform_6, window_bounds = array<i64: 1, 128>}, {transform_indices = @transform_7, window_bounds = array<i64: 32, 128>}]} {
    %c0 = arith.constant 0 : index
    %c0_0 = arith.constant 0 : index
    %0 = vector.load %arg1[%c0, %c0_0] : memref<32x4xf32, #tpu.memory_space<vmem>>, vector<32x4xf32>
    %c0_1 = arith.constant 0 : index
    %c0_2 = arith.constant 0 : index
    %1 = vector.load %arg2[%c0_1, %c0_2] : memref<4x32xf32, #tpu.memory_space<vmem>>, vector<4x32xf32>
    %c0_3 = arith.constant 0 : index
    %c0_4 = arith.constant 0 : index
    %2 = vector.load %arg3[%c0_3, %c0_4] : memref<1x32xf32, #tpu.memory_space<vmem>>, vector<1x32xf32>
    %cst = arith.constant dense<0.000000e+00> : vector<32x32xf32>
    %3 = tpu.matmul %0, %1, %cst {dimension_numbers = #tpu.dot_dimension_numbers<[1], [0], [0], [1], [0, 0, 1, 1], [], []>} : vector<32x4xf32>, vector<4x32xf32>, vector<32x32xf32> -> vector<32x32xf32>
    %4 = vector.broadcast %2 : vector<1x32xf32> to vector<32x32xf32>
    %5 = arith.addf %3, %4 : vector<32x32xf32>
    %cst_5 = arith.constant 0.000000e+00 : f32
    %6 = vector.broadcast %cst_5 : f32 to vector<32x32xf32>
    %7 = arith.maximumf %5, %6 : vector<32x32xf32>
    %c0_6 = arith.constant 0 : index
    %c0_7 = arith.constant 0 : index
    %8 = vector.load %arg4[%c0_6, %c0_7] : memref<32x32xf32, #tpu.memory_space<vmem>>, vector<32x32xf32>
    %c0_8 = arith.constant 0 : index
    %c0_9 = arith.constant 0 : index
    %9 = vector.load %arg5[%c0_8, %c0_9] : memref<1x32xf32, #tpu.memory_space<vmem>>, vector<1x32xf32>
    %cst_10 = arith.constant dense<0.000000e+00> : vector<32x32xf32>
    %10 = tpu.matmul %7, %8, %cst_10 {dimension_numbers = #tpu.dot_dimension_numbers<[1], [0], [0], [1], [0, 0, 1, 1], [], []>} : vector<32x32xf32>, vector<32x32xf32>, vector<32x32xf32> -> vector<32x32xf32>
    %11 = vector.broadcast %9 : vector<1x32xf32> to vector<32x32xf32>
    %12 = arith.addf %10, %11 : vector<32x32xf32>
    %cst_11 = arith.constant 0.000000e+00 : f32
    %13 = vector.broadcast %cst_11 : f32 to vector<32x32xf32>
    %14 = arith.maximumf %12, %13 : vector<32x32xf32>
    %c0_12 = arith.constant 0 : index
    %c0_13 = arith.constant 0 : index
    %15 = vector.load %arg6[%c0_12, %c0_13] : memref<32x128xf32, #tpu.memory_space<vmem>>, vector<32x128xf32>
    %c0_14 = arith.constant 0 : index
    %c0_15 = arith.constant 0 : index
    %16 = vector.load %arg7[%c0_14, %c0_15] : memref<1x128xf32, #tpu.memory_space<vmem>>, vector<1x128xf32>
    %cst_16 = arith.constant dense<0.000000e+00> : vector<32x128xf32>
    %17 = tpu.matmul %14, %15, %cst_16 {dimension_numbers = #tpu.dot_dimension_numbers<[1], [0], [0], [1], [0, 0, 1, 1], [], []>} : vector<32x32xf32>, vector<32x128xf32>, vector<32x128xf32> -> vector<32x128xf32>
    %18 = vector.broadcast %16 : vector<1x128xf32> to vector<32x128xf32>
    %19 = arith.addf %17, %18 : vector<32x128xf32>
    %cst_17 = arith.constant 0.000000e+00 : f32
    %20 = vector.broadcast %cst_17 : f32 to vector<32x128xf32>
    %21 = arith.maximumf %19, %20 : vector<32x128xf32>
    %c0_18 = arith.constant 0 : index
    %c0_19 = arith.constant 0 : index
    %22 = vector.load %arg8[%c0_18, %c0_19] : memref<32x128xf32, #tpu.memory_space<vmem>>, vector<32x128xf32>
    tpu.vector_store %arg8[%c0_18, %c0_19], %21 {strides = array<i32>} : memref<32x128xf32, #tpu.memory_space<vmem>>, vector<32x128xf32>,
    return
  }
  func.func @transform_0(%arg0: i32) -> (i32, i32) {
    %c0_i32 = arith.constant 0 : i32
    %c0_i32_0 = arith.constant 0 : i32
    return %arg0, %c0_i32 : i32, i32
  }
  func.func @transform_1(%arg0: i32) -> (i32, i32) {
    %c0_i32 = arith.constant 0 : i32
    %c0_i32_0 = arith.constant 0 : i32
    %c0_i32_1 = arith.constant 0 : i32
    return %c0_i32, %c0_i32_0 : i32, i32
  }
  func.func @transform_2(%arg0: i32) -> (i32, i32) {
    %c0_i32 = arith.constant 0 : i32
    %c0_i32_0 = arith.constant 0 : i32
    %c0_i32_1 = arith.constant 0 : i32
    return %c0_i32, %c0_i32_0 : i32, i32
  }
  func.func @transform_3(%arg0: i32) -> (i32, i32) {
    %c0_i32 = arith.constant 0 : i32
    %c0_i32_0 = arith.constant 0 : i32
    %c0_i32_1 = arith.constant 0 : i32
    return %c0_i32, %c0_i32_0 : i32, i32
  }
  func.func @transform_4(%arg0: i32) -> (i32, i32) {
    %c0_i32 = arith.constant 0 : i32
    %c0_i32_0 = arith.constant 0 : i32
    %c0_i32_1 = arith.constant 0 : i32
    return %c0_i32, %c0_i32_0 : i32, i32
  }
  func.func @transform_5(%arg0: i32) -> (i32, i32) {
    %c0_i32 = arith.constant 0 : i32
    %c0_i32_0 = arith.constant 0 : i32
    %c0_i32_1 = arith.constant 0 : i32
    return %c0_i32, %c0_i32_0 : i32, i32
  }
  func.func @transform_6(%arg0: i32) -> (i32, i32) {
    %c0_i32 = arith.constant 0 : i32
    %c0_i32_0 = arith.constant 0 : i32
    %c0_i32_1 = arith.constant 0 : i32
    return %c0_i32, %c0_i32_0 : i32, i32
  }
  func.func @transform_7(%arg0: i32) -> (i32, i32) {
    %c0_i32 = arith.constant 0 : i32
    %c0_i32_0 = arith.constant 0 : i32
    return %arg0, %c0_i32 : i32, i32
  }
}

</mosaic_0001>

<bundles_post_ra>
// kernel: conv1d_multilayer_pallas.1
= control target key start
LH: loop header
LB: loop body
LE: loop exit
PB: predicated region body
PF: predicated region fallthrough
CT: control target
= control target key end

     0   :  { %vm51_vm0 = vcmask 1043456   ;;  %vm38_vm1 = vcmask 31744   ;;  %vm155_vm2 = vcmask 261120   ;;  %s578_s1 = inlined_call_operand.vmem [shape: f32[4,32], index: 1, kind: input, shape index: {}]   ;;  %s579_s0 = inlined_call_operand.vmem [shape: f32[32,4], index: 0, kind: input, shape index: {}]   ;;  %s580_s3 = inlined_call_operand.vmem [shape: f32[32,32], index: 3, kind: input, shape index: {}]   ;;  %s581_s5 = inlined_call_operand.vmem [shape: f32[32,128], index: 5, kind: input, shape index: {}]   ;;  %s582_s2 = inlined_call_operand.vmem [shape: f32[1,32], index: 2, kind: input, shape index: {}]   ;;  %s583_s4 = inlined_call_operand.vmem [shape: f32[1,32], index: 4, kind: input, shape index: {}]   ;;  %s584_s6 = inlined_call_operand.vmem [shape: f32[1,128], index: 6, kind: input, shape index: {}]   ;;  %s585_s7 = inlined_call_operand.vmem [shape: f32[32,128], index: 7, kind: output, shape index: {}]  }
   0x1   :  { %v30_v0 = vld [vmem:[%s578_s1] sm:$0xf]  ;;  %v27_v2 = vld [vmem:[%s579_s0 + $0x8] sm:$0xff]  ;;  %v28_v3 = vld [vmem:[%s579_s0 + $0x10] sm:$0xff] }
   0x2   :  { %v26_v1 = vld [vmem:[%s579_s0] sm:$0xff]  ;;  %414 = vmatprep.subr.msk.mxu0 %vm51_vm0, %v30_v0  ;;  %v145_v5 = vld [vmem:[%s580_s3 + $0x8] sm:$0xff]  ;;  %v29_v7 = vld [vmem:[%s579_s0 + $0x18] sm:$0xff] }
   0x3   :  { %416 = vmatprep.mubr.msk.f32.mxu0 %vm38_vm1, %v26_v1  ;;  %v144_v4 = vld [vmem:[%s580_s3] sm:$0xff]  ;;  %415 = vmatpush3.msk.msra.mxu0 %vm51_vm0, %v30_v0  ;;  %v146_v8 = vld [vmem:[%s580_s3 + $0x10] sm:$0xff]  ;;  %v147_v9 = vld [vmem:[%s580_s3 + $0x18] sm:$0xff] }
   0x4   :  { %417 = vmatmul.mubr.msk.f32.vlgmr.msra.gmra.mrb[0].mxu0 %vm38_vm1, %v27_v2  ;;  %v450_v6 = vpack.c.bf16 %v145_v5, %v144_v4  ;;  %v454_v10 = vpack.c.bf16 %v147_v9, %v146_v8  ;;  %v257_v11 = vld [vmem:[%s581_s5] sm:$0xff]  ;;  %v258_v12 = vld [vmem:[%s581_s5 + $0x8] sm:$0xff]  ;;  %v259_v27 = vld [vmem:[%s581_s5 + $0x10] sm:$0xff] }
   0x5   :  { %419 = vmatprep.mubr.msk.f32.mxu0 %vm38_vm1, %v28_v3  ;;  %v458_v13 = vpack.c.bf16 %v258_v12, %v257_v11  ;;  %v377_v14 = vld [vmem:[%s582_s2] ss:$0 sm:$0xff]  ;;  %v260_v28 = vld [vmem:[%s581_s5 + $0x18] sm:$0xff] }
   0x6   :  { %451 = vmatprep.subr.bf16.mxu1 %v450_v6  ;;  %v462_v29 = vpack.c.bf16 %v260_v28, %v259_v27  ;;  %v383_v30 = vld [vmem:[%s583_s4] ss:$0 sm:$0xff] }
   0x7   :  { %453 = vmatpush3.bf16.msra.mxu1 %v450_v6  ;;  %459 = vmatprep.subr.bf16.mxu0 %v458_v13  ;;  %v388_v43 = vld [vmem:[%s584_s6] ss:$0 sm:$0xff] }
   0x8   :  { %420 = vmatmul.mubr.msk.f32.gmra.mrb[2].mxu0 %vm38_vm1, %v29_v7  ;;  %455 = vmatprep.subr.bf16.mxu1 %v454_v10 }
   0x9   :  { %461 = vmatpush3.bf16.msra.mxu0 %v458_v13 }
   0xa   :  { %463 = vmatprep.subr.bf16.mxu0 %v462_v29 }
   0xb   :  { %457 = vmatpush3.bf16.msra.mxu1 %v454_v10 }
   0xd   :  { %465 = vmatpush3.bf16.msra.mxu0 %v462_v29 }
  0xd7   :  { %v418_v15 = vpop.f32.mrb[0].mxu0 }
  0xd8   :  { %v127_v16 = vadd.f32 %v418_v15, %v377_v14  ;;  %v121_v17 = vpop.f32.mrb[1].mxu0 }
  0xd9   :  { %v122_v18 = vadd.f32 %v377_v14, %v121_v17 }
  0xda   :  { %v141_v21 = vmax.f32 %v127_v16, 0.0 }
  0xdb   :  { %v140_v19 = vmax.f32 %v122_v18, 0.0  ;;  %v421_v20 = vpop.f32.mrb[2].mxu0 }
  0xdc   :  { %v137_v22 = vadd.f32 %v421_v20, %v377_v14  ;;  %v131_v23 = vpop.f32.mrb[3].mxu0 }
  0xdd   :  { %v132_v24 = vadd.f32 %v377_v14, %v131_v23  ;;  %430 = vmatprep.mubr.msk.f32.mxu1 %vm155_vm2, %v140_v19 }
  0xde   :  { %431 = vmatmul.mubr.msk.f32.vlgmr.msra.gmra.mrb[0].mxu1 %vm155_vm2, %v141_v21  ;;  %v143_v26 = vmax.f32 %v137_v22, 0.0 }
  0xdf   :  { %v142_v25 = vmax.f32 %v132_v24, 0.0 }
  0xe1   :  { %433 = vmatprep.mubr.msk.f32.mxu1 %vm155_vm2, %v142_v25 }
  0xe2   :  { %434 = vmatmul.mubr.msk.f32.gmra.mrb[2].mxu1 %vm155_vm2, %v143_v26 }
 0x1b1   :  { %v432_v31 = vpop.f32.mrb[0].mxu1 }
 0x1b2   :  { %v240_v32 = vadd.f32 %v432_v31, %v383_v30  ;;  %v234_v33 = vpop.f32.mrb[1].mxu1 }
 0x1b3   :  { %v235_v34 = vadd.f32 %v383_v30, %v234_v33 }
 0x1b4   :  { %v254_v37 = vmax.f32 %v240_v32, 0.0 }
 0x1b5   :  { %v253_v35 = vmax.f32 %v235_v34, 0.0  ;;  %v435_v36 = vpop.f32.mrb[2].mxu1 }
 0x1b6   :  { %v250_v38 = vadd.f32 %v435_v36, %v383_v30  ;;  %v244_v39 = vpop.f32.mrb[3].mxu1 }
 0x1b7   :  { %v245_v40 = vadd.f32 %v383_v30, %v244_v39  ;;  %444 = vmatprep.mubr.msk.f32.mxu0 %vm155_vm2, %v253_v35 }
 0x1b8   :  { %445 = vmatmul.mubr.msk.f32.vlgmr.msra.gmra.mrb[4].mxu0 %vm155_vm2, %v254_v37  ;;  %v256_v42 = vmax.f32 %v250_v38, 0.0 }
 0x1b9   :  { %v255_v41 = vmax.f32 %v245_v40, 0.0 }
 0x1bb   :  { %447 = vmatprep.mubr.msk.f32.mxu0 %vm155_vm2, %v255_v41 }
 0x1bc   :  { %448 = vmatmul.mubr.msk.f32.gmra.mrb[6].mxu0 %vm155_vm2, %v256_v42 }
 0x28b   :  { %v446_v44 = vpop.f32.mrb[4].mxu0 }
 0x28c   :  { %v352_v45 = vadd.f32 %v446_v44, %v388_v43  ;;  %v346_v46 = vpop.f32.mrb[5].mxu0 }
 0x28d   :  { %v347_v47 = vadd.f32 %v388_v43, %v346_v46 }
 0x28e   :  { %v366_v48 = vmax.f32 %v352_v45, 0.0 }
 0x28f   :  { %v365_v49 = vmax.f32 %v347_v47, 0.0  ;;  %v449_v50 = vpop.f32.mrb[6].mxu0 }
 0x290   :  { %370 = vst [vmem:[%s585_s7 + $0x8] sm:$0xff] %v366_v48  ;;  %v362_v51 = vadd.f32 %v449_v50, %v388_v43  ;;  %v356_v52 = vpop.f32.mrb[7].mxu0 }
 0x291   :  { %369 = vst [vmem:[%s585_s7] sm:$0xff] %v365_v49  ;;  %v357_v53 = vadd.f32 %v388_v43, %v356_v52 }
 0x292   :  { %v368_v54 = vmax.f32 %v362_v51, 0.0 }
 0x293   :  { %v367_v55 = vmax.f32 %v357_v53, 0.0 }
 0x294   :  { %372 = vst [vmem:[%s585_s7 + $0x18] sm:$0xff] %v368_v54 }
 0x295   :  { %371 = vst [vmem:[%s585_s7 + $0x10] sm:$0xff] %v367_v55 }

</bundles_post_ra>
